<compile_context>
chip_gen: v7x
topology: tpu7x:2x2x1
jax: 0.10.0
libtpu: 0.0.40
codegen_flags: <defaults>
</compile_context>

<pallas_src>
import jax
import jax.numpy as jnp
from jax.experimental import pallas as pl
from jax.experimental.pallas import tpu as pltpu

ALEN = 16
X_DIM = 258
XC_DIM = 1024
H1_IN = X_DIM + ALEN   # 274
H1_OUT = 16
H2_OUT = 16
OUT_DIM = 1


def regnetau_kernel(x_ref, xc_ref,
                    w2x_ref, w1e_ref, be_ref,
                    w3_ref, b3_ref,
                    w4_ref, b4_ref,
                    out_ref):
    # fc1 folded into fc[0]: h1 = relu(x@W2x + xc@W1_eff + b_eff)
    # x/xc/w2x/w1_eff are bf16; both dots accumulate in f32 on the MXU.
    h1 = (jnp.dot(x_ref[...], w2x_ref[...], preferred_element_type=jnp.float32)
          + jnp.dot(xc_ref[...], w1e_ref[...], preferred_element_type=jnp.float32)
          + be_ref[...])
    h1 = jnp.maximum(h1, 0.0)               # ReLU; Dropout -> identity (eval)

    # fc[3]: Linear(16, 16) + ReLU (+ Dropout identity)
    h2 = jnp.dot(h1, w3_ref[...], preferred_element_type=jnp.float32) + b3_ref[...]
    h2 = jnp.maximum(h2, 0.0)

    # fc[6]: Linear(16, 1) + Sigmoid
    logits = jnp.dot(h2, w4_ref[...], preferred_element_type=jnp.float32) + b4_ref[...]
    out_ref[...] = jax.nn.sigmoid(logits).astype(out_ref.dtype)


def _pick_batch_tile(B, tb_max):
    """Batch tile: multiple of 8, <= tb_max, and >= 2 tiles whenever B > 8
    so both v7x TensorCores get work under dimension_semantics=("parallel",)."""
    if B <= 8:
        return B                       # single tiny tile (equals full dim)
    target = pl.cdiv(B, 2)             # aim for at least 2 tiles
    tb = min(tb_max, ((target + 7) // 8) * 8)
    return max(8, tb)


def regnetau_forward(x, xc, params, *, tb_max=1024):
    B = x.shape[0]
    # Feed the dominant streams as bf16 (no-op if the producer already emits bf16).
    x = x.astype(jnp.bfloat16)
    xc = xc.astype(jnp.bfloat16)

    TB = _pick_batch_tile(B, tb_max)
    grid = (pl.cdiv(B, TB),)

    def row_spec(cols):
        return pl.BlockSpec((TB, cols), lambda i: (i, 0))

    def const_spec(shape):
        # Constant block index -> DMA'd once, VMEM-resident across all tiles.
        return pl.BlockSpec(shape, lambda i: (0, 0))

    flops = 2 * B * (XC_DIM * H1_OUT + X_DIM * H1_OUT
                     + H1_OUT * H2_OUT + H2_OUT * OUT_DIM)
    weight_bytes = (2 * (XC_DIM + X_DIM) * H1_OUT              # bf16 big weights
                    + 4 * (H1_OUT + H1_OUT * H2_OUT + H2_OUT
                           + H2_OUT * OUT_DIM + OUT_DIM))      # f32 small params
    bytes_accessed = B * (XC_DIM + X_DIM) * 2 + B * OUT_DIM * 4 + weight_bytes

    return pl.pallas_call(
        regnetau_kernel,
        out_shape=jax.ShapeDtypeStruct((B, OUT_DIM), jnp.float32),
        grid=grid,
        in_specs=[
            row_spec(X_DIM),                      # x      (TB, 258)   bf16
            row_spec(XC_DIM),                     # xc     (TB, 1024)  bf16
            const_spec((X_DIM, H1_OUT)),          # w2x               bf16
            const_spec((XC_DIM, H1_OUT)),         # w1_eff = w1 @ w2c bf16
            const_spec((1, H1_OUT)),              # b_eff  = b1 @ w2c + b2 (f32)
            const_spec((H1_OUT, H2_OUT)),         # w3  (f32)
            const_spec((1, H2_OUT)),              # b3  (f32)
            const_spec((H2_OUT, OUT_DIM)),        # w4  (f32)
            const_spec((1, OUT_DIM)),             # b4  (f32)
        ],
        out_specs=row_spec(OUT_DIM),
        compiler_params=pltpu.CompilerParams(
            dimension_semantics=("parallel",),        # shard batch tiles over TCs
            vmem_limit_bytes=32 * 1024 * 1024),       # explicit budget (lifts v5e's 16 MiB default)
        cost_estimate=pl.CostEstimate(
            flops=flops, transcendentals=B, bytes_accessed=bytes_accessed),
    )(x, xc,
      params["w2x"], params["w1_eff"], params["b_eff"],
      params["w3"], params["b3"],
      params["w4"], params["b4"])


def init_params(key):
    # Deterministic synthetic init (matches _initialize_weights spirit:
    # weights ~ N(0, 0.01), biases = 0).
    ks = jax.random.split(key, 4)
    std = 0.01
    w1 = std * jax.random.normal(ks[0], (XC_DIM, ALEN), jnp.float32)
    b1 = jnp.zeros((1, ALEN), jnp.float32)
    w2 = std * jax.random.normal(ks[1], (H1_IN, H1_OUT), jnp.float32)
    b2 = jnp.zeros((1, H1_OUT), jnp.float32)
    w3 = std * jax.random.normal(ks[2], (H1_OUT, H2_OUT), jnp.float32)
    b3 = jnp.zeros((1, H2_OUT), jnp.float32)
    w4 = std * jax.random.normal(ks[3], (H2_OUT, OUT_DIM), jnp.float32)
    b4 = jnp.zeros((1, OUT_DIM), jnp.float32)

    w2x = w2[:X_DIM, :]
    w2c = w2[X_DIM:, :]
    # Host-side fold of fc1 into fc[0]'s xc branch (exact: no activation between).
    w1_eff = w1 @ w2c
    b_eff = b1 @ w2c + b2

    return {
        # kernel params (big matmul operands in bf16, small ones in f32)
        "w2x": w2x.astype(jnp.bfloat16),
        "w1_eff": w1_eff.astype(jnp.bfloat16),
        "b_eff": b_eff,
        "w3": w3, "b3": b3,
        "w4": w4, "b4": b4,
        # unfolded f32 params (reference only)
        "w1": w1, "b1": b1, "w2_full": w2, "b2": b2,
    }


def reference_forward(x, xc, p):
    # Pure-JAX f32 reference following the PyTorch module exactly (eval mode).
    xcf = xc @ p["w1"] + p["b1"]
    feat = jnp.concatenate([x, xcf], axis=1)
    h1 = jnp.maximum(feat @ p["w2_full"] + p["b2"], 0.0)
    h2 = jnp.maximum(h1 @ p["w3"] + p["b3"], 0.0)
    return jax.nn.sigmoid(h2 @ p["w4"] + p["b4"])


if __name__ == "__main__":
    key = jax.random.PRNGKey(0)
    k_x, k_xc, k_p = jax.random.split(key, 3)

    B = 8
    # Producer emits bf16 streams (the kernel's dominant HBM traffic).
    x = jax.random.normal(k_x, (B, X_DIM), jnp.float32).astype(jnp.bfloat16)
    xc = jax.random.normal(k_xc, (B, XC_DIM), jnp.float32).astype(jnp.bfloat16)
    params = init_params(k_p)

    out = regnetau_forward(x, xc, params)
    out = jax.block_until_ready(out)

    # Reference uses the same (bf16-rounded) input values in f32 math with
    # unfolded f32 weights; remaining error is bf16 weight/MXU precision.
    ref = reference_forward(x.astype(jnp.float32), xc.astype(jnp.float32), params)
    assert out.shape == (B, OUT_DIM)
    assert jnp.allclose(out, ref, atol=2e-3, rtol=2e-3), (
        f"max abs diff {jnp.max(jnp.abs(out - ref))}")
    print("KERNEL_OK")
</pallas_src>

<mosaic_0001>
module attributes {stable_mosaic.version = 11 : i64} {
  func.func @regnetau_kernel(%arg0: i32, %arg1: memref<8x258xbf16, #tpu.memory_space<vmem>>, %arg2: memref<8x1024xbf16, #tpu.memory_space<vmem>>, %arg3: memref<258x16xbf16, #tpu.memory_space<vmem>>, %arg4: memref<1024x16xbf16, #tpu.memory_space<vmem>>, %arg5: memref<1x16xf32, #tpu.memory_space<vmem>>, %arg6: memref<16x16xf32, #tpu.memory_space<vmem>>, %arg7: memref<1x16xf32, #tpu.memory_space<vmem>>, %arg8: memref<16x1xf32, #tpu.memory_space<vmem>>, %arg9: memref<1x1xf32, #tpu.memory_space<vmem>>, %arg10: memref<8x1xf32, #tpu.memory_space<vmem>>) attributes {dimension_semantics = [#tpu.dimension_semantics<parallel>], iteration_bounds = array<i64: 1>, scalar_prefetch = 0 : i64, scratch_operands = 0 : i64, tpu.core_type = #tpu.core_type<tc>, window_params = [{transform_indices = @transform_0, window_bounds = array<i64: 8, 258>}, {transform_indices = @transform_1, window_bounds = array<i64: 8, 1024>}, {pipeline_mode = #tpu.pipeline_mode<synchronous>, transform_indices = @transform_2, window_bounds = array<i64: 258, 16>}, {pipeline_mode = #tpu.pipeline_mode<synchronous>, transform_indices = @transform_3, window_bounds = array<i64: 1024, 16>}, {pipeline_mode = #tpu.pipeline_mode<synchronous>, transform_indices = @transform_4, window_bounds = array<i64: 1, 16>}, {pipeline_mode = #tpu.pipeline_mode<synchronous>, transform_indices = @transform_5, window_bounds = array<i64: 16, 16>}, {pipeline_mode = #tpu.pipeline_mode<synchronous>, transform_indices = @transform_6, window_bounds = array<i64: 1, 16>}, {pipeline_mode = #tpu.pipeline_mode<synchronous>, transform_indices = @transform_7, window_bounds = array<i64: 16, 1>}, {pipeline_mode = #tpu.pipeline_mode<synchronous>, transform_indices = @transform_8, window_bounds = array<i64: 1, 1>}, {transform_indices = @transform_9, window_bounds = array<i64: 8, 1>}]} {
    %c0 = arith.constant 0 : index
    %c0_0 = arith.constant 0 : index
    %0 = vector.load %arg1[%c0, %c0_0] : memref<8x258xbf16, #tpu.memory_space<vmem>>, vector<8x258xbf16>
    %c0_1 = arith.constant 0 : index
    %c0_2 = arith.constant 0 : index
    %1 = vector.load %arg3[%c0_1, %c0_2] : memref<258x16xbf16, #tpu.memory_space<vmem>>, vector<258x16xbf16>
    %cst = arith.constant dense<0.000000e+00> : vector<8x16xf32>
    %2 = tpu.matmul %0, %1, %cst {dimension_numbers = #tpu.dot_dimension_numbers<[1], [0], [0], [1], [0, 0, 1, 1], [], []>} : vector<8x258xbf16>, vector<258x16xbf16>, vector<8x16xf32> -> vector<8x16xf32>
    %c0_3 = arith.constant 0 : index
    %c0_4 = arith.constant 0 : index
    %3 = vector.load %arg2[%c0_3, %c0_4] : memref<8x1024xbf16, #tpu.memory_space<vmem>>, vector<8x1024xbf16>
    %c0_5 = arith.constant 0 : index
    %c0_6 = arith.constant 0 : index
    %4 = vector.load %arg4[%c0_5, %c0_6] : memref<1024x16xbf16, #tpu.memory_space<vmem>>, vector<1024x16xbf16>
    %cst_7 = arith.constant dense<0.000000e+00> : vector<8x16xf32>
    %5 = tpu.matmul %3, %4, %cst_7 {dimension_numbers = #tpu.dot_dimension_numbers<[1], [0], [0], [1], [0, 0, 1, 1], [], []>} : vector<8x1024xbf16>, vector<1024x16xbf16>, vector<8x16xf32> -> vector<8x16xf32>
    %6 = arith.addf %2, %5 : vector<8x16xf32>
    %c0_8 = arith.constant 0 : index
    %c0_9 = arith.constant 0 : index
    %7 = vector.load %arg5[%c0_8, %c0_9] : memref<1x16xf32, #tpu.memory_space<vmem>>, vector<1x16xf32>
    %8 = vector.broadcast %7 : vector<1x16xf32> to vector<8x16xf32>
    %9 = arith.addf %6, %8 : vector<8x16xf32>
    %cst_10 = arith.constant 0.000000e+00 : f32
    %10 = vector.broadcast %cst_10 : f32 to vector<8x16xf32>
    %11 = arith.maximumf %9, %10 : vector<8x16xf32>
    %c0_11 = arith.constant 0 : index
    %c0_12 = arith.constant 0 : index
    %12 = vector.load %arg6[%c0_11, %c0_12] : memref<16x16xf32, #tpu.memory_space<vmem>>, vector<16x16xf32>
    %cst_13 = arith.constant dense<0.000000e+00> : vector<8x16xf32>
    %13 = tpu.matmul %11, %12, %cst_13 {dimension_numbers = #tpu.dot_dimension_numbers<[1], [0], [0], [1], [0, 0, 1, 1], [], []>} : vector<8x16xf32>, vector<16x16xf32>, vector<8x16xf32> -> vector<8x16xf32>
    %c0_14 = arith.constant 0 : index
    %c0_15 = arith.constant 0 : index
    %14 = vector.load %arg7[%c0_14, %c0_15] : memref<1x16xf32, #tpu.memory_space<vmem>>, vector<1x16xf32>
    %15 = vector.broadcast %14 : vector<1x16xf32> to vector<8x16xf32>
    %16 = arith.addf %13, %15 : vector<8x16xf32>
    %cst_16 = arith.constant 0.000000e+00 : f32
    %17 = vector.broadcast %cst_16 : f32 to vector<8x16xf32>
    %18 = arith.maximumf %16, %17 : vector<8x16xf32>
    %c0_17 = arith.constant 0 : index
    %c0_18 = arith.constant 0 : index
    %19 = vector.load %arg8[%c0_17, %c0_18] : memref<16x1xf32, #tpu.memory_space<vmem>>, vector<16x1xf32>
    %cst_19 = arith.constant dense<0.000000e+00> : vector<8x1xf32>
    %20 = tpu.matmul %18, %19, %cst_19 {dimension_numbers = #tpu.dot_dimension_numbers<[1], [0], [0], [1], [0, 0, 1, 1], [], []>} : vector<8x16xf32>, vector<16x1xf32>, vector<8x1xf32> -> vector<8x1xf32>
    %c0_20 = arith.constant 0 : index
    %c0_21 = arith.constant 0 : index
    %21 = vector.load %arg9[%c0_20, %c0_21] : memref<1x1xf32, #tpu.memory_space<vmem>>, vector<1x1xf32>
    %22 = vector.broadcast %21 : vector<1x1xf32> to vector<8x1xf32>
    %23 = arith.addf %20, %22 : vector<8x1xf32>
    %24 = arith.negf %23 : vector<8x1xf32>
    %25 = math.exp %24 : vector<8x1xf32>
    %cst_22 = arith.constant 1.000000e+00 : f32
    %26 = vector.broadcast %cst_22 : f32 to vector<8x1xf32>
    %27 = arith.addf %26, %25 : vector<8x1xf32>
    %28 = arith.divf %26, %27 : vector<8x1xf32>
    %c0_23 = arith.constant 0 : index
    %c0_24 = arith.constant 0 : index
    %29 = vector.load %arg10[%c0_23, %c0_24] : memref<8x1xf32, #tpu.memory_space<vmem>>, vector<8x1xf32>
    tpu.vector_store %arg10[%c0_23, %c0_24], %28 {strides = array<i32>} : memref<8x1xf32, #tpu.memory_space<vmem>>, vector<8x1xf32>,
    return
  }
  func.func @transform_0(%arg0: i32) -> (i32, i32) {
    %c0_i32 = arith.constant 0 : i32
    %c0_i32_0 = arith.constant 0 : i32
    return %arg0, %c0_i32 : i32, i32
  }
  func.func @transform_1(%arg0: i32) -> (i32, i32) {
    %c0_i32 = arith.constant 0 : i32
    %c0_i32_0 = arith.constant 0 : i32
    return %arg0, %c0_i32 : i32, i32
  }
  func.func @transform_2(%arg0: i32) -> (i32, i32) {
    %c0_i32 = arith.constant 0 : i32
    %c0_i32_0 = arith.constant 0 : i32
    %c0_i32_1 = arith.constant 0 : i32
    return %c0_i32, %c0_i32_0 : i32, i32
  }
  func.func @transform_3(%arg0: i32) -> (i32, i32) {
    %c0_i32 = arith.constant 0 : i32
    %c0_i32_0 = arith.constant 0 : i32
    %c0_i32_1 = arith.constant 0 : i32
    return %c0_i32, %c0_i32_0 : i32, i32
  }
  func.func @transform_4(%arg0: i32) -> (i32, i32) {
    %c0_i32 = arith.constant 0 : i32
    %c0_i32_0 = arith.constant 0 : i32
    %c0_i32_1 = arith.constant 0 : i32
    return %c0_i32, %c0_i32_0 : i32, i32
  }
  func.func @transform_5(%arg0: i32) -> (i32, i32) {
    %c0_i32 = arith.constant 0 : i32
    %c0_i32_0 = arith.constant 0 : i32
    %c0_i32_1 = arith.constant 0 : i32
    return %c0_i32, %c0_i32_0 : i32, i32
  }
  func.func @transform_6(%arg0: i32) -> (i32, i32) {
    %c0_i32 = arith.constant 0 : i32
    %c0_i32_0 = arith.constant 0 : i32
    %c0_i32_1 = arith.constant 0 : i32
    return %c0_i32, %c0_i32_0 : i32, i32
  }
  func.func @transform_7(%arg0: i32) -> (i32, i32) {
    %c0_i32 = arith.constant 0 : i32
    %c0_i32_0 = arith.constant 0 : i32
    %c0_i32_1 = arith.constant 0 : i32
    return %c0_i32, %c0_i32_0 : i32, i32
  }
  func.func @transform_8(%arg0: i32) -> (i32, i32) {
    %c0_i32 = arith.constant 0 : i32
    %c0_i32_0 = arith.constant 0 : i32
    %c0_i32_1 = arith.constant 0 : i32
    return %c0_i32, %c0_i32_0 : i32, i32
  }
  func.func @transform_9(%arg0: i32) -> (i32, i32) {
    %c0_i32 = arith.constant 0 : i32
    %c0_i32_0 = arith.constant 0 : i32
    return %arg0, %c0_i32 : i32, i32
  }
}

</mosaic_0001>

<bundles_post_ra>
// kernel: tpu_custom_call.1
= control target key start
LH: loop header
LB: loop body
LE: loop exit
PB: predicated region body
PF: predicated region fallthrough
CT: control target
= control target key end

     0   :  { %vm1501_vm0 = vmmov 0   ;;  %vm887_vm1 = vcmask 1040384   ;;  %vm883_vm2 = vcmask 15360   ;;  %vm989_vm3 = vcmask 130048   ;;  %s1847_s3 = inlined_call_operand.vmem [shape: bf16[1024,16], index: 3, kind: input, shape index: {}]   ;;  %s1848_s1 = inlined_call_operand.vmem [shape: bf16[8,1024], index: 1, kind: input, shape index: {}]   ;;  %s1849_s2 = inlined_call_operand.vmem [shape: bf16[258,16], index: 2, kind: input, shape index: {}]   ;;  %s1850_s0 = inlined_call_operand.vmem [shape: bf16[8,258], index: 0, kind: input, shape index: {}]   ;;  %s1851_s5 = inlined_call_operand.vmem [shape: f32[16,16], index: 5, kind: input, shape index: {}]   ;;  %s1852_s4 = inlined_call_operand.vmem [shape: f32[1,16], index: 4, kind: input, shape index: {}]   ;;  %s1853_s7 = inlined_call_operand.vmem [shape: f32[16,1], index: 7, kind: input, shape index: {}]   ;;  %s1854_s8 = inlined_call_operand.<no memory space> [shape: f32[1,1], index: 8, kind: input, shape index: {}]   ;;  %s1855_s6 = inlined_call_operand.vmem [shape: f32[1,16], index: 6, kind: input, shape index: {}]   ;;  %s1856_s9 = inlined_call_operand.vmem [shape: f32[8,1], index: 9, kind: output, shape index: {}]  }
   0x1   :  { %v1404_v0 = vld [vmem:[%s1847_s3 + $0x40] sm:$0xff]   ;;  %v1408_v4 = vld [vmem:[%s1847_s3 + $0x48] sm:$0xff]   ;;  %v1412_v8 = vld [vmem:[%s1847_s3 + $0x50] sm:$0xff]   ;;  %vm1152_vm4 = vcmask 7168  }
   0x2   :  { %v1405_v1 = vld [vmem:[%s1847_s3 + $0xc0] sm:$0xff]   ;;  %1257 = vmatprep.subr.bf16.mxu0 %v1404_v0  ;;  %v1409_v5 = vld [vmem:[%s1847_s3 + $0xc8] sm:$0xff]   ;;  %v1413_v9 = vld [vmem:[%s1847_s3 + $0xd0] sm:$0xff]  }
   0x3   :  { %v1406_v2 = vld [vmem:[%s1847_s3] sm:$0xff]   ;;  %1279 = vmatprep.subr.bf16.mxu1 %v1405_v1  ;;  %v1410_v6 = vld [vmem:[%s1847_s3 + $0x8] sm:$0xff]   ;;  %v1414_v10 = vld [vmem:[%s1847_s3 + $0x10] sm:$0xff]  }
   0x4   :  { %v1407_v3 = vld [vmem:[%s1847_s3 + $0x80] sm:$0xff]   ;;  %1258 = vmatpush3.bf16.msra.mxu0 %v1406_v2  ;;  %v1411_v7 = vld [vmem:[%s1847_s3 + $0x88] sm:$0xff]   ;;  %v1415_v11 = vld [vmem:[%s1847_s3 + $0x90] sm:$0xff]  }
   0x5   :  { %1280 = vmatpush3.bf16.msra.mxu1 %v1407_v3  ;;  %1259 = vmatprep.subr.bf16.mxu0 %v1408_v4  ;;  %v1416_v12 = vld [vmem:[%s1847_s3 + $0x58] sm:$0xff]   ;;  %v1420_v16 = vld [vmem:[%s1847_s3 + $0x60] sm:$0xff]   ;;  %v1424_v20 = vld [vmem:[%s1847_s3 + $0x68] sm:$0xff]  }
   0x6   :  { %1281 = vmatprep.subr.bf16.mxu1 %v1409_v5  ;;  %v1417_v13 = vld [vmem:[%s1847_s3 + $0xd8] sm:$0xff]   ;;  %v1421_v17 = vld [vmem:[%s1847_s3 + $0xe0] sm:$0xff]   ;;  %v1425_v21 = vld [vmem:[%s1847_s3 + $0xe8] sm:$0xff]  }
   0x7   :  { %v1418_v14 = vld [vmem:[%s1847_s3 + $0x18] sm:$0xff]   ;;  %v1422_v18 = vld [vmem:[%s1847_s3 + $0x20] sm:$0xff]   ;;  %v1426_v22 = vld [vmem:[%s1847_s3 + $0x28] sm:$0xff]  }
   0x8   :  { %1260 = vmatpush3.bf16.msra.mxu0 %v1410_v6  ;;  %v1419_v15 = vld [vmem:[%s1847_s3 + $0x98] sm:$0xff]   ;;  %v1423_v19 = vld [vmem:[%s1847_s3 + $0xa0] sm:$0xff]   ;;  %v1427_v23 = vld [vmem:[%s1847_s3 + $0xa8] sm:$0xff]  }
   0x9   :  { %1282 = vmatpush3.bf16.msra.mxu1 %v1411_v7  ;;  %1261 = vmatprep.subr.bf16.mxu0 %v1412_v8  ;;  %v1428_v24 = vld [vmem:[%s1847_s3 + $0x70] sm:$0xff]   ;;  %v1432_v28 = vld [vmem:[%s1847_s3 + $0x78] sm:$0xff]   ;;  %v70_v32 = vld [vmem:[%s1848_s1] sm:$0xff] }
   0xa   :  { %1283 = vmatprep.subr.bf16.mxu1 %v1413_v9  ;;  %v1429_v25 = vld [vmem:[%s1847_s3 + $0xf0] sm:$0xff]   ;;  %v1433_v29 = vld [vmem:[%s1847_s3 + $0xf8] sm:$0xff]   ;;  %v71_v33 = vld [vmem:[%s1848_s1 + $0x8] sm:$0xff]  ;;  %v1158_v34 = vcombine.low %v70_v32, %v70_v32  ;;  %v1159_v35 = vcombine.high %v70_v32, %v70_v32 }
   0xb   :  { %v1430_v26 = vld [vmem:[%s1847_s3 + $0x30] sm:$0xff]   ;;  %v1434_v30 = vld [vmem:[%s1847_s3 + $0x38] sm:$0xff]   ;;  %v1160_v36 = vcombine.low %v71_v33, %v71_v33  ;;  %v1161_v37 = vcombine.high %v71_v33, %v71_v33  ;;  %v1440_v38 = vld [vmem:[%s1847_s3 + $0x140] sm:$0xff]  }
   0xc   :  { %1262 = vmatpush3.bf16.msra.mxu0 %v1414_v10  ;;  %v1431_v27 = vld [vmem:[%s1847_s3 + $0xb0] sm:$0xff]   ;;  %v1435_v31 = vld [vmem:[%s1847_s3 + $0xb8] sm:$0xff]   ;;  %v1441_v39 = vld [vmem:[%s1847_s3 + $0x100] sm:$0xff]   ;;  %646 = vmatprep.mubr.bf16.mxu0 %v1159_v35 }
   0xd   :  { %1284 = vmatpush3.bf16.msra.mxu1 %v1415_v11  ;;  %1263 = vmatprep.subr.bf16.mxu0 %v1416_v12  ;;  %v1442_v40 = vld [vmem:[%s1847_s3 + $0x1c0] sm:$0xff]   ;;  %v1444_v42 = vld [vmem:[%s1847_s3 + $0x148] sm:$0xff]   ;;  %v1448_v46 = vld [vmem:[%s1847_s3 + $0x150] sm:$0xff]  }
   0xe   :  { %1285 = vmatprep.subr.bf16.mxu1 %v1417_v13  ;;  %686 = vmatprep.mubr.bf16.mxu1 %v1161_v37  ;;  %v1443_v41 = vld [vmem:[%s1847_s3 + $0x180] sm:$0xff]   ;;  %v1445_v43 = vld [vmem:[%s1847_s3 + $0x108] sm:$0xff]   ;;  %v1449_v47 = vld [vmem:[%s1847_s3 + $0x110] sm:$0xff]  }
   0xf   :  { %v1446_v44 = vld [vmem:[%s1847_s3 + $0x1c8] sm:$0xff]   ;;  %v1450_v48 = vld [vmem:[%s1847_s3 + $0x1d0] sm:$0xff]   ;;  %v1452_v50 = vld [vmem:[%s1847_s3 + $0x158] sm:$0xff]  }
  0x10   :  { %1264 = vmatpush3.bf16.msra.mxu0 %v1418_v14  ;;  %v1447_v45 = vld [vmem:[%s1847_s3 + $0x188] sm:$0xff]   ;;  %v1451_v49 = vld [vmem:[%s1847_s3 + $0x190] sm:$0xff]   ;;  %v1453_v51 = vld [vmem:[%s1847_s3 + $0x118] sm:$0xff]  }
  0x11   :  { %1286 = vmatpush3.bf16.msra.mxu1 %v1419_v15  ;;  %1265 = vmatprep.subr.bf16.mxu0 %v1420_v16  ;;  %v1454_v52 = vld [vmem:[%s1847_s3 + $0x1d8] sm:$0xff]   ;;  %v1456_v54 = vld [vmem:[%s1847_s3 + $0x160] sm:$0xff]   ;;  %v1460_v58 = vld [vmem:[%s1847_s3 + $0x168] sm:$0xff]   ;;  %v1500_v15 = vmov 0.0  }
  0x12   :  { %1287 = vmatprep.subr.bf16.mxu1 %v1421_v17  ;;  %v1455_v53 = vld [vmem:[%s1847_s3 + $0x198] sm:$0xff]   ;;  %v1457_v55 = vld [vmem:[%s1847_s3 + $0x120] sm:$0xff]   ;;  %v1461_v59 = vld [vmem:[%s1847_s3 + $0x128] sm:$0xff]  }
  0x13   :  { %v1458_v56 = vld [vmem:[%s1847_s3 + $0x1e0] sm:$0xff]   ;;  %v1462_v60 = vld [vmem:[%s1847_s3 + $0x1e8] sm:$0xff]   ;;  %v1464_v62 = vld [vmem:[%s1847_s3 + $0x170] sm:$0xff]  }
  0x14   :  { %1266 = vmatpush3.bf16.msra.mxu0 %v1422_v18  ;;  %v1459_v57 = vld [vmem:[%s1847_s3 + $0x1a0] sm:$0xff]   ;;  %v1463_v61 = vld [vmem:[%s1847_s3 + $0x1a8] sm:$0xff]   ;;  %v1465_v63 = vld [vmem:[%s1847_s3 + $0x130] sm:$0xff]  }
  0x15   :  { %1288 = vmatpush3.bf16.msra.mxu1 %v1423_v19  ;;  %1267 = vmatprep.subr.bf16.mxu0 %v1424_v20  ;;  %v1466_v0 = vld [vmem:[%s1847_s3 + $0x1f0] sm:$0xff]   ;;  %v1468_v2 = vld [vmem:[%s1847_s3 + $0x178] sm:$0xff]   ;;  %v1474_v9 = vld [vmem:[%s1849_s2 + $0x40] sm:$0xff]  }
  0x16   :  { %1289 = vmatprep.subr.bf16.mxu1 %v1425_v21  ;;  %v1467_v1 = vld [vmem:[%s1847_s3 + $0x1b0] sm:$0xff]   ;;  %v1469_v3 = vld [vmem:[%s1847_s3 + $0x138] sm:$0xff]   ;;  %v1477_v13 = vld [vmem:[%s1849_s2] sm:$0xff]  }
  0x17   :  { %v1470_v4 = vld [vmem:[%s1847_s3 + $0x1f8] sm:$0xff]   ;;  %v72_v5 = vld [vmem:[%s1848_s1 + $0x10] sm:$0xff]  ;;  %v1478_v14 = vld [vmem:[%s1849_s2 + $0x48] sm:$0xff]  }
  0x18   :  { %1268 = vmatpush3.bf16.msra.mxu0 %v1426_v22  ;;  %v1163_v6 = vcombine.high %v72_v5, %v72_v5  ;;  %v1473_v7 = vld [vmem:[%s1847_s3 + $0x1b8] sm:$0xff]   ;;  %v1162_v8 = vcombine.low %v72_v5, %v72_v5  ;;  %v1479_v16 = vld [vmem:[%s1849_s2 + $0x8] sm:$0xff]   ;;  %v1480_v17 = vld [vmem:[%s1849_s2 + $0x50] sm:$0xff]  }
  0x19   :  { %1290 = vmatpush3.bf16.msra.mxu1 %v1427_v23  ;;  %1269 = vmatprep.subr.bf16.mxu0 %v1428_v24  ;;  %v73_v10 = vld [vmem:[%s1848_s1 + $0x18] sm:$0xff]  ;;  %v1481_v18 = vld [vmem:[%s1849_s2 + $0x10] sm:$0xff]   ;;  %v1484_v21 = vld [vmem:[%s1849_s2 + $0x60] sm:$0xff]  }
  0x1a   :  { %1291 = vmatprep.subr.bf16.mxu1 %v1429_v25  ;;  %v1164_v11 = vcombine.low %v73_v10, %v73_v10  ;;  %v1165_v12 = vcombine.high %v73_v10, %v73_v10  ;;  %v1482_v19 = vld [vmem:[%s1849_s2 + $0x58] sm:$0xff]   ;;  %v1492_v22 = vld [vmem:[%s1849_s2 + $0x80] ss:$0 sps:$4 sm:$0x11]   ;;  %v1486_v25 = vld [vmem:[%s1849_s2 + $0x68] sm:$0xff]  }
  0x1b   :  { %v1483_v20 = vld [vmem:[%s1849_s2 + $0x18] sm:$0xff]   ;;  %v1485_v23 = vld [vmem:[%s1849_s2 + $0x20] sm:$0xff]  }
  0x1c   :  { %1270 = vmatpush3.bf16.msra.mxu0 %v1430_v26  ;;  %v35_v24 = vld [vmem:[%s1850_s0] sm:$0xff]  ;;  %v889_v26 = vsel %vm887_vm1, %v1492_v22, 0  ;;  %v1490_v32 = vld [vmem:[%s1849_s2 + $0x78] sm:$0xff]  }
  0x1d   :  { %1292 = vmatpush3.bf16.msra.mxu1 %v1431_v27  ;;  %1271 = vmatprep.subr.bf16.mxu0 %v1432_v28  ;;  %v1231_v27 = vcombine.high %v35_v24, %v35_v24  ;;  %v1495_v28 = vld [vmem:[%s1850_s0 + $0x8] ss:$0 sps:$4 sm:$0xff]   ;;  %v1491_v33 = vld [vmem:[%s1849_s2 + $0x38] sm:$0xff]   ;;  %v980_v35 = vld [vmem:[%s1851_s5] sm:$0xff] }
  0x1e   :  { %1293 = vmatprep.subr.bf16.mxu1 %v1433_v29  ;;  %v1487_v29 = vld [vmem:[%s1849_s2 + $0x28] sm:$0xff]  }
  0x20   :  { %1272 = vmatpush3.bf16.msra.mxu0 %v1434_v30  ;;  %v1488_v30 = vld [vmem:[%s1849_s2 + $0x70] sm:$0xff]  }
  0x21   :  { %1294 = vmatpush3.bf16.msra.mxu1 %v1435_v31  ;;  %1301 = vmatprep.subr.bf16.mxu0 %v1440_v38  ;;  %v1489_v31 = vld [vmem:[%s1849_s2 + $0x30] sm:$0xff]   ;;  %v1502_v38 = vmov 0.0|0.0  }
  0x22   :  { %1323 = vmatprep.subr.bf16.mxu1 %v1442_v40 }
  0x23   :  { %647 = vmatmul.mubr.bf16.vlgmr.msra.gmra.mrb[0].mxu0 %v1158_v34  ;;  %v1230_v34 = vcombine.low %v35_v24, %v35_v24 }
  0x24   :  { %687 = vmatmul.mubr.bf16.vlgmr.msra.gmra.mrb[0].mxu1 %v1160_v36  ;;  %1302 = vmatpush3.bf16.msra.mxu0 %v1441_v39  ;;  %v981_v36 = vld [vmem:[%s1851_s5 + $0x8] sm:$0xff] }
  0x25   :  { %1324 = vmatpush3.bf16.msra.mxu1 %v1443_v41  ;;  %1303 = vmatprep.subr.bf16.mxu0 %v1444_v42  ;;  %v1396_v37 = vpack.c.bf16 %v981_v36, %v980_v35 }
  0x26   :  { %1325 = vmatprep.subr.bf16.mxu1 %v1446_v44  ;;  %726 = vmatprep.mubr.bf16.mxu0 %v1163_v6 }
  0x27   :  { %766 = vmatprep.mubr.bf16.mxu1 %v1165_v12  ;;  %v1064_v12 = vld [vmem:[%s1853_s7] sm:$0xff] }
  0x28   :  { %1304 = vmatpush3.bf16.msra.mxu0 %v1445_v43 }
  0x29   :  { %1326 = vmatpush3.bf16.msra.mxu1 %v1447_v45  ;;  %1305 = vmatprep.subr.bf16.mxu0 %v1448_v46 }
  0x2a   :  { %1327 = vmatprep.subr.bf16.mxu1 %v1450_v48 }
  0x2c   :  { %1306 = vmatpush3.bf16.msra.mxu0 %v1449_v47 }
  0x2d   :  { %1328 = vmatpush3.bf16.msra.mxu1 %v1451_v49  ;;  %1307 = vmatprep.subr.bf16.mxu0 %v1452_v50 }
  0x2e   :  { %1329 = vmatprep.subr.bf16.mxu1 %v1454_v52 }
  0x30   :  { %1308 = vmatpush3.bf16.msra.mxu0 %v1453_v51 }
  0x31   :  { %1330 = vmatpush3.bf16.msra.mxu1 %v1455_v53  ;;  %1309 = vmatprep.subr.bf16.mxu0 %v1456_v54 }
  0x32   :  { %1331 = vmatprep.subr.bf16.mxu1 %v1458_v56 }
  0x34   :  { %1310 = vmatpush3.bf16.msra.mxu0 %v1457_v55 }
  0x35   :  { %1332 = vmatpush3.bf16.msra.mxu1 %v1459_v57  ;;  %1311 = vmatprep.subr.bf16.mxu0 %v1460_v58 }
  0x36   :  { %1333 = vmatprep.subr.bf16.mxu1 %v1462_v60 }
  0x38   :  { %1312 = vmatpush3.bf16.msra.mxu0 %v1461_v59 }
  0x39   :  { %1334 = vmatpush3.bf16.msra.mxu1 %v1463_v61  ;;  %1313 = vmatprep.subr.bf16.mxu0 %v1464_v62 }
  0x3a   :  { %1335 = vmatprep.subr.bf16.mxu1 %v1466_v0 }
  0x3c   :  { %1314 = vmatpush3.bf16.msra.mxu0 %v1465_v63 }
  0x3d   :  { %1336 = vmatpush3.bf16.msra.mxu1 %v1467_v1  ;;  %1315 = vmatprep.subr.bf16.mxu0 %v1468_v2 }
  0x3e   :  { %1337 = vmatprep.subr.bf16.mxu1 %v1470_v4 }
  0x40   :  { %1316 = vmatpush3.bf16.msra.mxu0 %v1469_v3 }
  0x41   :  { %1338 = vmatpush3.bf16.msra.mxu1 %v1473_v7  ;;  %1345 = vmatprep.subr.bf16.mxu0 %v1474_v9 }
  0x42   :  { %1375 = vmatprep.subr.bf16.mxu1 %v1500_v15 }
  0x43   :  { %727 = vmatmul.mubr.bf16.vlgmr.msra.gmra.mrb[4].mxu0 %v1162_v8  ;;  %v1251_v8 = vld [vmem:[%s1852_s4] ss:$0 sm:$0xff] }
  0x44   :  { %1346 = vmatpush3.bf16.msra.mxu0 %v1477_v13  ;;  %767 = vmatmul.mubr.bf16.vlgmr.msra.gmra.mrb[4].mxu1 %v1164_v11  ;;  %v1065_v13 = vld [vmem:[%s1853_s7 + $0x8] sm:$0xff] }
  0x45   :  { %1347 = vmatprep.subr.bf16.mxu0 %v1478_v14  ;;  %1377 = vmatprep.mubr.msk.bf16.mxu1 %vm1501_vm0, %v1500_v15  ;;  %v1399_v14 = vpack.c.bf16 %v1065_v13, %v1064_v12 }
  0x46   :  { %1376 = vmatpush3.bf16.msra.mxu1 %v889_v26  ;;  %923 = vmatprep.mubr.bf16.mxu0 %v1231_v27 }
  0x47   :  { %1395 = vmatprep.subr.bf16.mxu1 %v1502_v38 }
  0x48   :  { %1348 = vmatpush3.bf16.msra.mxu0 %v1479_v16  ;;  %v14_v16 = vstv %s1854_s8 }
  0x49   :  { %1349 = vmatprep.subr.bf16.mxu0 %v1480_v17  ;;  %15 = vst [vmem:[#allocation2] sm:$0x1] %v14_v16  ;;  %v1252_v17 = vld [vmem:[%s1855_s6] ss:$0 sm:$0xff] }
  0x4c   :  { %1350 = vmatpush3.bf16.msra.mxu0 %v1481_v18  ;;  %1378 = vmatmul.mubr.msk.bf16.vlgmr.msra.gmra.mrb[8].mxu1 %vm883_vm2, %v1495_v28 }
  0x4d   :  { %1351 = vmatprep.subr.bf16.mxu0 %v1482_v19  ;;  %1385 = vmatprep.mubr.msk.f32.mxu1 %vm1501_vm0, %v1500_v15 }
  0x4e   :  { %1397 = vmatpush3.bf16.msra.mxu1 %v1396_v37 }
  0x4f   :  { %1398 = vmatprep.subr.bf16.mxu1 %v1502_v38 }
  0x50   :  { %1352 = vmatpush3.bf16.msra.mxu0 %v1483_v20 }
  0x51   :  { %1353 = vmatprep.subr.bf16.mxu0 %v1484_v21  ;;  %v1254_v21 = vld [vmem:[#allocation2] ss:$0 sm:$0xff] }
  0x54   :  { %1354 = vmatpush3.bf16.msra.mxu0 %v1485_v23 }
  0x55   :  { %1355 = vmatprep.subr.bf16.mxu0 %v1486_v25 }
  0x58   :  { %1356 = vmatpush3.bf16.msra.mxu0 %v1487_v29 }
  0x59   :  { %1357 = vmatprep.subr.bf16.mxu0 %v1488_v30 }
  0x5c   :  { %1358 = vmatpush3.bf16.msra.mxu0 %v1489_v31 }
  0x5d   :  { %1359 = vmatprep.subr.bf16.mxu0 %v1490_v32 }
  0x60   :  { %1360 = vmatpush3.bf16.msra.mxu0 %v1491_v33 }
  0x63   :  { %924 = vmatmul.mubr.bf16.vlgmr.msra.gmra.mrb[8].mxu0 %v1230_v34 }
  0xf6   :  { %v1273_v39 = vpop.f32.mrb[0].mxu0 }
  0xf7   :  { %v1295_v40 = vpop.f32.mrb[0].mxu1  ;;  %v1274_v41 = vpop.f32.mrb[1].mxu0 }
  0xf8   :  { %v1296_v42 = vpop.f32.mrb[1].mxu1  ;;  %v1275_v43 = vadd.f32 %v1274_v41, %v1273_v39  ;;  %v1276_v45 = vpop.f32.mrb[2].mxu0 }
  0xf9   :  { %v1297_v44 = vadd.f32 %v1296_v42, %v1295_v40  ;;  %v1298_v46 = vpop.f32.mrb[2].mxu1  ;;  %v1277_v47 = vpop.f32.mrb[3].mxu0 }
  0xfa   :  { %v1299_v48 = vpop.f32.mrb[3].mxu1 }
  0xfb   :  { %v689_v49 = vadd.f32 %v1297_v44, %v1275_v43 }
 0x116   :  { %v1317_v50 = vpop.f32.mrb[4].mxu0 }
 0x117   :  { %v1318_v51 = vpop.f32.mrb[5].mxu0  ;;  %v1339_v52 = vpop.f32.mrb[4].mxu1 }
 0x118   :  { %v1319_v53 = vadd.f32 %v1318_v51, %v1317_v50  ;;  %v1320_v54 = vpop.f32.mrb[6].mxu0  ;;  %v1340_v55 = vpop.f32.mrb[5].mxu1 }
 0x119   :  { %v1321_v56 = vpop.f32.mrb[7].mxu0  ;;  %v1341_v57 = vadd.f32 %v1340_v55, %v1339_v52  ;;  %v1342_v58 = vpop.f32.mrb[6].mxu1 }
 0x11a   :  { %v729_v59 = vadd.f32 %v1319_v53, %v689_v49  ;;  %v1343_v60 = vpop.f32.mrb[7].mxu1 }
 0x11c   :  { %v769_v61 = vadd.f32 %v1341_v57, %v729_v59 }
 0x11f   :  { %v965_v62 = vpop.f32.mrb[8].mxu1 }
 0x120   :  { %v1379_v63 = vpop.f32.mrb[9].mxu1 }
 0x121   :  { %v968_v0 = vpop.f32.mrb[10].mxu1 }
 0x122   :  { %v1380_v1 = vpop.f32.mrb[11].mxu1 }
 0x136   :  { %v1361_v2 = vpop.f32.mrb[8].mxu0 }
 0x137   :  { %v1362_v3 = vpop.f32.mrb[9].mxu0 }
 0x138   :  { %v1363_v4 = vadd.f32 %v1362_v3, %v1361_v2  ;;  %v1364_v5 = vpop.f32.mrb[10].mxu0 }
 0x139   :  { %v1365_v6 = vpop.f32.mrb[11].mxu0 }
 0x13a   :  { %v926_v7 = vadd.f32 %v1363_v4, %v769_v61 }
 0x13c   :  { %v966_v9 = vadd.f32 %v965_v62, %v926_v7 }
 0x13e   :  { %v978_v10 = vadd.f32 %v1251_v8, %v966_v9 }
 0x140   :  { %v979_v11 = vmax.f32 %v978_v10, 0.0 }
 0x142   :  { %1386 = vmatmul.mubr.msk.f32.vlgmr.msra.gmra.mrb[12].mxu1 %vm989_vm3, %v979_v11 }
 0x143   :  { %1392 = vmatprep.mubr.msk.f32.mxu1 %vm1501_vm0, %v1500_v15  ;;  %1400 = vmatpush3.bf16.msra.mxu1 %v1399_v14 }
 0x215   :  { %v1059_v15 = vpop.f32.mrb[12].mxu1 }
 0x216   :  { %v1060_v18 = vadd.f32 %v1252_v17, %v1059_v15  ;;  %v1387_v19 = vpop.f32.mrb[13].mxu1 }
 0x218   :  { %v1063_v20 = vmax.f32 %v1060_v18, 0.0 }
 0x21a   :  { %1393 = vmatmul.mubr.msk.f32.vlgmr.msra.gmra.mrb[14].mxu1 %vm989_vm3, %v1063_v20 }
 0x2ed   :  { %v1142_v22 = vpop.f32.mrb[14].mxu1 }
 0x2ee   :  { %v1143_v23 = vadd.f32 %v1254_v21, %v1142_v22  ;;  %v1394_v24 = vpop.f32.mrb[15].mxu1 }
 0x2f0   :  { %v1256_v25 = vmul.f32 -1.442695, %v1143_v23 }
 0x2f2   :  { %1496 = vpow2.f32 %v1256_v25 }
 0x2fc   :  { %v1497_v26 = vpop.eup %1496 }
 0x2fd   :  { %v1149_v27 = vadd.f32 1.0, %v1497_v26 }
 0x2ff   :  { %1498 = vrcp.f32 %v1149_v27 }
 0x309   :  { %v1499_v28 = vpop.eup %1498 }
 0x30a   :  { %1153 = vst.msk [vmem:[%s1856_s9] sm:$0xff] %vm1152_vm4, %v1499_v28 }

</bundles_post_ra>
